<compile_context>
chip_gen: v7x
topology: tpu7x:2x2x1
jax: 0.10.0
libtpu: 0.0.40
codegen_flags: <defaults>
</compile_context>

<pallas_src>
import jax
import jax.numpy as jnp
from jax.experimental import pallas as pl
from jax.experimental.pallas import tpu as pltpu


# ----------------------------- kernel ---------------------------------------


def _head_kernel(seq_ref, mask_ref, w_ref, b_ref, out_ref, acc_ref, len_ref):
    # seq_ref : (bT, sT, H)   native dtype (f32 / bf16)
    # mask_ref: (bT, 1, sT)   f32
    # w_ref   : (H, 2)        f32   (decoder weight, pre-transposed; resident)
    # b_ref   : (1, 2)        f32   (resident)
    # out_ref : (bT, 1, 2)    f32
    # acc_ref : (bT, 1, H)    f32 scratch (masked-sum accumulator)
    # len_ref : (bT, 1, 1)    f32 scratch (mask-length accumulator)
    s_idx = pl.program_id(1)

    @pl.when(s_idx == 0)
    def _init():
        acc_ref[...] = jnp.zeros_like(acc_ref)
        len_ref[...] = jnp.zeros_like(len_ref)

    seq = seq_ref[...]
    mask = mask_ref[...]

    # Masked sum over this sequence tile as a batched MXU contraction,
    # accumulated in f32 (inputs stay in their native dtype; the mask cast is
    # exact for 0/1 masks).
    acc_ref[...] += jnp.einsum(
        "bqs,bsh->bqh", mask.astype(seq.dtype), seq,
        preferred_element_type=jnp.float32)
    len_ref[...] += jnp.sum(mask, axis=-1, keepdims=True)

    @pl.when(s_idx == pl.num_programs(1) - 1)
    def _finalize():
        # Clamp protects all-zero-mask rows (PyTorch would produce NaN/Inf);
        # identical result whenever every row has at least one valid token.
        lengths = jnp.maximum(len_ref[...], 1.0)               # (bT, 1, 1)
        pooled = (acc_ref[...] / lengths)[:, 0, :]             # (bT, H)  f32
        logits = jnp.dot(pooled, w_ref[...],
                         preferred_element_type=jnp.float32) + b_ref[...]
        out_ref[:, 0, :] = logits.astype(out_ref.dtype)


# --------------------------- tile planning ----------------------------------


def _rnd(x, m):
    return ((x + m - 1) // m) * m


def _largest_divisor_leq(n, cap):
    cap = max(1, min(cap, n))
    for d in range(cap, 0, -1):
        if n % d == 0:
            return d
    return 1


def _vmem_capacity_bytes():
    """Per-core VMEM capacity; conservative fallback if the query fails."""
    try:
        cap = int(pltpu.get_tpu_info().vmem_capacity_bytes)
        if cap > 0:
            return cap
    except Exception:
        pass
    return 64 * 1024 * 1024   # v7x per-TensorCore VMEM (safe lower bound)


def _vmem_usage_estimate(bT, sT, H, itemsize):
    """Rough VMEM footprint (with layout padding + double buffering)."""
    seq_buf = bT * _rnd(sT, 16) * _rnd(H, 128) * itemsize     # (bT, sT, H)
    mask_buf = bT * 8 * _rnd(sT, 128) * 4                      # (bT, 1, sT)
    w_buf = _rnd(H, 8) * 128 * 4                                # (H, 2)
    b_buf = 8 * 128 * 4                                         # (1, 2)
    out_buf = bT * 8 * 128 * 4                                  # (bT, 1, 2)
    acc = bT * 8 * _rnd(H, 128) * 4                             # scratch
    lens = bT * 8 * 128 * 4                                     # scratch
    # Inputs / outputs are double-buffered by the BlockSpec pipeline.
    return 2 * (seq_buf + mask_buf + w_buf + b_buf + out_buf) + acc + lens


def _pick_seq_tile(bT, s, H, itemsize, budget):
    """Largest sequence tile (full s, else a 128-aligned divisor) under budget."""
    def seq_bytes(st):
        return bT * st * _rnd(H, 128) * itemsize
    if seq_bytes(s) <= budget:
        return s
    start = (s // 128) * 128
    if start == s:
        start -= 128
    for st in range(start, 0, -128):
        if s % st == 0 and seq_bytes(st) <= budget:
            return st
    return None


def _plan_tiles(B, S, H, itemsize, batch_tile=None, seq_tile=None,
                per_buffer_budget_bytes=None):
    vmem_cap = _vmem_capacity_bytes()
    if per_buffer_budget_bytes is None:
        # A double-buffered sequence tile may use up to ~half of VMEM; the rest
        # stays free for mask buffers, scratch and compiler headroom.
        per_buffer_budget_bytes = vmem_cap // 4

    # Batch tile: start at <= 8 rows, and keep >= 2 steps on the parallel axis
    # when B >= 2 so both v7x TensorCores get work (the S axis is the
    # accumulator / "arbitrary" axis and cannot be split across cores).
    if batch_tile is not None:
        bT = int(batch_tile)
        assert B % bT == 0, (B, bT)
    else:
        bT = _largest_divisor_leq(B, 8 if B < 2 else min(8, B // 2))

    S_pad = S
    if seq_tile is not None:
        sT = int(seq_tile)
        assert S % sT == 0, (S, sT)
    else:
        sT = _pick_seq_tile(bT, S, H, itemsize, per_buffer_budget_bytes)
        if sT is None:
            # No lane-aligned divisor fits: zero-pad S to a multiple of 128
            # (padded positions carry mask == 0, so the result is unchanged).
            S_pad = -(-S // 128) * 128
            sT = _pick_seq_tile(bT, S_pad, H, itemsize, per_buffer_budget_bytes)
        while sT is None and bT > 1:               # e.g. very large H
            bT = _largest_divisor_leq(B, bT - 1)
            sT = _pick_seq_tile(bT, S_pad, H, itemsize, per_buffer_budget_bytes)
        if sT is None:                             # last resort (S_pad % 128 == 0)
            sT = 128 if S_pad % 128 == 0 else S_pad

    if batch_tile is None:
        # Grow the batch tile into leftover budget (sequence tile grows first),
        # while still keeping >= 2 parallel grid steps when B >= 2.
        cap = B if B < 2 else B // 2
        for cand in range(bT + 1, cap + 1):
            if (B % cand == 0 and
                    cand * sT * _rnd(H, 128) * itemsize <= per_buffer_budget_bytes):
                bT = cand

    # Scoped-VMEM request: cover the actual footprint plus headroom, but never
    # ask for (nearly) all of physical VMEM (v7x only has 64 MiB per core).
    est = _vmem_usage_estimate(bT, sT, H, itemsize)
    vmem_limit = min(max(est + 4 * 1024 * 1024, 16 * 1024 * 1024),
                     int(0.75 * vmem_cap))
    vmem_limit = max(vmem_limit, est + 2 * 1024 * 1024)   # never under-request
    vmem_limit = min(vmem_limit, vmem_cap)
    return bT, sT, S_pad, vmem_limit


# ------------------------------ wrapper -------------------------------------


def bert_one_feature_head(sequence_output, sequence_mask, weight, bias,
                          batch_tile=None, seq_tile=None,
                          per_buffer_budget_bytes=None):
    """Forward pass of BertForOneFeaturePredictionHead.

    sequence_output: (B, S, H) f32/bf16, sequence_mask: (B, S) numeric (0/1),
    weight: (2, H) (PyTorch nn.Linear layout), bias: (2,). Returns (B, 2) f32.

    Notes:
      * Rows whose mask is all zeros return finite values (length clamped to 1)
        where PyTorch would return NaN/Inf.
      * The mask is cast to the activation dtype inside the MXU contraction;
        exact for 0/1 masks (non-binary mask weights would lose precision in
        bf16).
      * `per_buffer_budget_bytes` is a test hook to force small tiles/padding.
    """
    B, S, H = sequence_output.shape
    itemsize = jnp.dtype(sequence_output.dtype).itemsize

    bT, sT, S_pad, vmem_limit = _plan_tiles(
        B, S, H, itemsize, batch_tile, seq_tile, per_buffer_budget_bytes)

    seq = sequence_output                                    # keep native dtype
    mask = sequence_mask.astype(jnp.float32)
    if S_pad != S:
        seq = jnp.pad(seq, ((0, 0), (0, S_pad - S), (0, 0)))
        mask = jnp.pad(mask, ((0, 0), (0, S_pad - S)))
    mask = mask.reshape(B, 1, S_pad)
    w_t = jnp.transpose(weight).astype(jnp.float32)          # (H, 2)
    b2 = bias.astype(jnp.float32).reshape(1, 2)

    grid = (B // bT, S_pad // sT)

    cost = pl.CostEstimate(
        flops=2 * B * S_pad * H + 4 * B * H,
        transcendentals=0,
        bytes_accessed=(B * S_pad * H * itemsize + B * S_pad * 4
                        + H * 2 * 4 + B * 2 * 4),
    )

    out3 = pl.pallas_call(
        _head_kernel,
        out_shape=jax.ShapeDtypeStruct((B, 1, 2), jnp.float32),
        grid_spec=pltpu.PrefetchScalarGridSpec(
            num_scalar_prefetch=0,
            grid=grid,
            in_specs=[
                pl.BlockSpec((bT, sT, H), lambda bi, si: (bi, si, 0)),
                pl.BlockSpec((bT, 1, sT), lambda bi, si: (bi, 0, si)),
                pl.BlockSpec((H, 2), lambda bi, si: (0, 0)),   # resident weight
                pl.BlockSpec((1, 2), lambda bi, si: (0, 0)),   # resident bias
            ],
            # Same output block across the S axis -> accumulator semantics.
            out_specs=pl.BlockSpec((bT, 1, 2), lambda bi, si: (bi, 0, 0)),
            scratch_shapes=[
                pltpu.VMEM((bT, 1, H), jnp.float32),   # masked-sum accumulator
                pltpu.VMEM((bT, 1, 1), jnp.float32),   # mask-length accumulator
            ],
        ),
        compiler_params=pltpu.CompilerParams(
            dimension_semantics=("parallel", "arbitrary"),
            vmem_limit_bytes=vmem_limit,
        ),
        cost_estimate=cost,
    )(seq, mask, w_t, b2)
    return out3[:, 0, :]


def reference(sequence_output, sequence_mask, weight, bias):
    seq = sequence_output.astype(jnp.float32)
    mask = sequence_mask.astype(jnp.float32)
    lengths = jnp.sum(mask, axis=-1).reshape(-1, 1, 1)
    pooled = jnp.sum(seq * mask[:, :, None] / lengths, axis=1)
    return pooled @ weight.astype(jnp.float32).T + bias.astype(jnp.float32)


if __name__ == "__main__":
    key = jax.random.PRNGKey(0)

    # --- Test 1: small shapes implied by the module -------------------------
    B, S, H = 2, 8, 32
    k_seq, k_mask, k_w, k_b = jax.random.split(key, 4)
    sequence_output = jax.random.normal(k_seq, (B, S, H), dtype=jnp.float32)
    lens = jnp.array([5, 8], dtype=jnp.int32)          # >= 1 valid token / row
    sequence_mask = (jnp.arange(S)[None, :] < lens[:, None]).astype(jnp.float32)
    weight = jax.random.normal(k_w, (2, H), dtype=jnp.float32) * 0.02
    bias = jax.random.normal(k_b, (2,), dtype=jnp.float32) * 0.02

    out = jax.block_until_ready(
        bert_one_feature_head(sequence_output, sequence_mask, weight, bias))
    ref = reference(sequence_output, sequence_mask, weight, bias)
    assert out.shape == (B, 2)
    assert jnp.allclose(out, ref, atol=1e-5, rtol=1e-5), (out, ref)

    # --- Test 2: tiled S reduction + split parallel batch axis --------------
    B2, S2, H2 = 8, 256, 128
    k_seq2, k_w2, k_b2 = jax.random.split(jax.random.PRNGKey(1), 3)
    seq2 = jax.random.normal(k_seq2, (B2, S2, H2), dtype=jnp.float32)
    lens2 = jnp.arange(1, B2 + 1, dtype=jnp.int32) * (S2 // B2)
    mask2 = (jnp.arange(S2)[None, :] < lens2[:, None]).astype(jnp.float32)
    w2 = jax.random.normal(k_w2, (2, H2), dtype=jnp.float32) * 0.02
    b2v = jax.random.normal(k_b2, (2,), dtype=jnp.float32) * 0.02

    out2 = jax.block_until_ready(
        bert_one_feature_head(seq2, mask2, w2, b2v, seq_tile=128))  # grid (2, 2)
    ref2 = reference(seq2, mask2, w2, b2v)
    assert jnp.allclose(out2, ref2, atol=1e-4, rtol=1e-4), (out2, ref2)

    # --- Test 3: native bf16 activations stream without a wrapper up-cast ---
    out3 = jax.block_until_ready(
        bert_one_feature_head(seq2.astype(jnp.bfloat16), mask2, w2, b2v,
                              seq_tile=128))
    assert jnp.allclose(out3, ref2, atol=5e-2, rtol=5e-2), (out3, ref2)

    # --- Test 4: batch not a multiple of 8 (divisor-search fallback) --------
    B4, S4, H4 = 3, 96, 64
    k_seq4, k_w4, k_b4 = jax.random.split(jax.random.PRNGKey(2), 3)
    seq4 = jax.random.normal(k_seq4, (B4, S4, H4), dtype=jnp.float32)
    lens4 = jnp.array([10, 50, 96], dtype=jnp.int32)
    mask4 = (jnp.arange(S4)[None, :] < lens4[:, None]).astype(jnp.float32)
    w4 = jax.random.normal(k_w4, (2, H4), dtype=jnp.float32) * 0.02
    b4 = jax.random.normal(k_b4, (2,), dtype=jnp.float32) * 0.02
    out4 = jax.block_until_ready(bert_one_feature_head(seq4, mask4, w4, b4))
    ref4 = reference(seq4, mask4, w4, b4)
    assert jnp.allclose(out4, ref4, atol=1e-5, rtol=1e-5), (out4, ref4)

    # --- Test 5: awkward S under a tiny VMEM budget -> zero-padding path ----
    B5, S5, H5 = 2, 200, 128
    k_seq5, k_w5, k_b5 = jax.random.split(jax.random.PRNGKey(3), 3)
    seq5 = jax.random.normal(k_seq5, (B5, S5, H5), dtype=jnp.float32)
    lens5 = jnp.array([7, 200], dtype=jnp.int32)
    mask5 = (jnp.arange(S5)[None, :] < lens5[:, None]).astype(jnp.float32)
    w5 = jax.random.normal(k_w5, (2, H5), dtype=jnp.float32) * 0.02
    b5 = jax.random.normal(k_b5, (2,), dtype=jnp.float32) * 0.02
    out5 = jax.block_until_ready(
        bert_one_feature_head(seq5, mask5, w5, b5,
                              per_buffer_budget_bytes=64 * 1024))
    ref5 = reference(seq5, mask5, w5, b5)
    assert jnp.allclose(out5, ref5, atol=1e-4, rtol=1e-4), (out5, ref5)

    print("KERNEL_OK")
</pallas_src>

<mosaic_0001>
module attributes {stable_mosaic.version = 11 : i64} {
  func.func @_head_kernel(%arg0: i32, %arg1: i32, %arg2: memref<1x8x32xf32, #tpu.memory_space<vmem>>, %arg3: memref<1x1x8xf32, #tpu.memory_space<vmem>>, %arg4: memref<32x2xf32, #tpu.memory_space<vmem>>, %arg5: memref<1x2xf32, #tpu.memory_space<vmem>>, %arg6: memref<1x1x2xf32, #tpu.memory_space<vmem>>, %arg7: memref<1x1x32xf32, #tpu.memory_space<vmem>>, %arg8: memref<1x1x1xf32, #tpu.memory_space<vmem>>) attributes {dimension_semantics = [#tpu.dimension_semantics<parallel>, #tpu.dimension_semantics<arbitrary>], iteration_bounds = array<i64: 2, 1>, scalar_prefetch = 0 : i64, scratch_operands = 2 : i64, tpu.core_type = #tpu.core_type<tc>, window_params = [{transform_indices = @transform_0, window_bounds = array<i64: 1, 8, 32>}, {transform_indices = @transform_1, window_bounds = array<i64: 1, 1, 8>}, {pipeline_mode = #tpu.pipeline_mode<synchronous>, transform_indices = @transform_2, window_bounds = array<i64: 32, 2>}, {pipeline_mode = #tpu.pipeline_mode<synchronous>, transform_indices = @transform_3, window_bounds = array<i64: 1, 2>}, {transform_indices = @transform_4, window_bounds = array<i64: 1, 1, 2>}]} {
    %c0_i32 = arith.constant 0 : i32
    %0 = arith.cmpi eq, %arg1, %c0_i32 : i32
    %1 = arith.extui %0 : i1 to i32
    %c0_i32_0 = arith.constant 0 : i32
    %2 = arith.cmpi ne, %1, %c0_i32_0 : i32
    scf.if %2 {
      %cst_21 = arith.constant 0.000000e+00 : f32
      %17 = vector.broadcast %cst_21 : f32 to vector<1x1x32xf32>
      %c0_22 = arith.constant 0 : index
      %c0_23 = arith.constant 0 : index
      %c0_24 = arith.constant 0 : index
      %18 = vector.load %arg7[%c0_22, %c0_23, %c0_24] : memref<1x1x32xf32, #tpu.memory_space<vmem>>, vector<1x1x32xf32>
      tpu.vector_store %arg7[%c0_22, %c0_23, %c0_24], %17 {strides = array<i32>} : memref<1x1x32xf32, #tpu.memory_space<vmem>>, vector<1x1x32xf32>,
      %cst_25 = arith.constant 0.000000e+00 : f32
      %19 = vector.broadcast %cst_25 : f32 to vector<1x1x1xf32>
      %c0_26 = arith.constant 0 : index
      %c0_27 = arith.constant 0 : index
      %c0_28 = arith.constant 0 : index
      %20 = vector.load %arg8[%c0_26, %c0_27, %c0_28] : memref<1x1x1xf32, #tpu.memory_space<vmem>>, vector<1x1x1xf32>
      tpu.vector_store %arg8[%c0_26, %c0_27, %c0_28], %19 {strides = array<i32>} : memref<1x1x1xf32, #tpu.memory_space<vmem>>, vector<1x1x1xf32>,
    } else {
    }
    %c0 = arith.constant 0 : index
    %c0_1 = arith.constant 0 : index
    %c0_2 = arith.constant 0 : index
    %3 = vector.load %arg2[%c0, %c0_1, %c0_2] : memref<1x8x32xf32, #tpu.memory_space<vmem>>, vector<1x8x32xf32>
    %c0_3 = arith.constant 0 : index
    %c0_4 = arith.constant 0 : index
    %c0_5 = arith.constant 0 : index
    %4 = vector.load %arg3[%c0_3, %c0_4, %c0_5] : memref<1x1x8xf32, #tpu.memory_space<vmem>>, vector<1x1x8xf32>
    %c0_6 = arith.constant 0 : index
    %c0_7 = arith.constant 0 : index
    %c0_8 = arith.constant 0 : index
    %5 = vector.load %arg7[%c0_6, %c0_7, %c0_8] : memref<1x1x32xf32, #tpu.memory_space<vmem>>, vector<1x1x32xf32>
    "tpu.trace_start"() <{level = 10 : i32, message = "bqs,bsh->bqh"}> : () -> ()
    %cst = arith.constant dense<0.000000e+00> : vector<1x1x32xf32>
    %6 = tpu.matmul %4, %3, %cst {dimension_numbers = #tpu.dot_dimension_numbers<[2], [1], [1], [2], [0, 0, 0, 1, 1, 2], [0], [0]>} : vector<1x1x8xf32>, vector<1x8x32xf32>, vector<1x1x32xf32> -> vector<1x1x32xf32>
    "tpu.trace_stop"() : () -> ()
    %7 = arith.addf %5, %6 : vector<1x1x32xf32>
    %c0_9 = arith.constant 0 : index
    %c0_10 = arith.constant 0 : index
    %c0_11 = arith.constant 0 : index
    %8 = vector.load %arg7[%c0_9, %c0_10, %c0_11] : memref<1x1x32xf32, #tpu.memory_space<vmem>>, vector<1x1x32xf32>
    tpu.vector_store %arg7[%c0_9, %c0_10, %c0_11], %7 {strides = array<i32>} : memref<1x1x32xf32, #tpu.memory_space<vmem>>, vector<1x1x32xf32>,
    %c0_12 = arith.constant 0 : index
    %c0_13 = arith.constant 0 : index
    %c0_14 = arith.constant 0 : index
    %9 = vector.load %arg8[%c0_12, %c0_13, %c0_14] : memref<1x1x1xf32, #tpu.memory_space<vmem>>, vector<1x1x1xf32>
    %cst_15 = arith.constant dense<0.000000e+00> : vector<1x1xf32>
    %10 = vector.multi_reduction <add>, %4, %cst_15 [2] : vector<1x1x8xf32> to vector<1x1xf32>
    %11 = vector.shape_cast %10 : vector<1x1xf32> to vector<1x1x1xf32>
    %12 = arith.addf %9, %11 : vector<1x1x1xf32>
    %c0_16 = arith.constant 0 : index
    %c0_17 = arith.constant 0 : index
    %c0_18 = arith.constant 0 : index
    %13 = vector.load %arg8[%c0_16, %c0_17, %c0_18] : memref<1x1x1xf32, #tpu.memory_space<vmem>>, vector<1x1x1xf32>
    tpu.vector_store %arg8[%c0_16, %c0_17, %c0_18], %12 {strides = array<i32>} : memref<1x1x1xf32, #tpu.memory_space<vmem>>, vector<1x1x1xf32>,
    %c0_i32_19 = arith.constant 0 : i32
    %14 = arith.cmpi eq, %arg1, %c0_i32_19 : i32
    %15 = arith.extui %14 : i1 to i32
    %c0_i32_20 = arith.constant 0 : i32
    %16 = arith.cmpi ne, %15, %c0_i32_20 : i32
    scf.if %16 {
      %c0_21 = arith.constant 0 : index
      %c0_22 = arith.constant 0 : index
      %c0_23 = arith.constant 0 : index
      %17 = vector.load %arg8[%c0_21, %c0_22, %c0_23] : memref<1x1x1xf32, #tpu.memory_space<vmem>>, vector<1x1x1xf32>
      %cst_24 = arith.constant 1.000000e+00 : f32
      %18 = vector.broadcast %cst_24 : f32 to vector<1x1x1xf32>
      %19 = arith.maximumf %17, %18 : vector<1x1x1xf32>
      %c0_25 = arith.constant 0 : index
      %c0_26 = arith.constant 0 : index
      %c0_27 = arith.constant 0 : index
      %20 = vector.load %arg7[%c0_25, %c0_26, %c0_27] : memref<1x1x32xf32, #tpu.memory_space<vmem>>, vector<1x1x32xf32>
      %21 = vector.broadcast %19 : vector<1x1x1xf32> to vector<1x1x32xf32>
      %22 = arith.divf %20, %21 : vector<1x1x32xf32>
      %23 = vector.shape_cast %22 : vector<1x1x32xf32> to vector<1x32xf32>
      %c0_28 = arith.constant 0 : index
      %c0_29 = arith.constant 0 : index
      %24 = vector.load %arg4[%c0_28, %c0_29] : memref<32x2xf32, #tpu.memory_space<vmem>>, vector<32x2xf32>
      %cst_30 = arith.constant dense<0.000000e+00> : vector<1x2xf32>
      %25 = tpu.matmul %23, %24, %cst_30 {dimension_numbers = #tpu.dot_dimension_numbers<[1], [0], [0], [1], [0, 0, 1, 1], [], []>} : vector<1x32xf32>, vector<32x2xf32>, vector<1x2xf32> -> vector<1x2xf32>
      %c0_31 = arith.constant 0 : index
      %c0_32 = arith.constant 0 : index
      %26 = vector.load %arg5[%c0_31, %c0_32] : memref<1x2xf32, #tpu.memory_space<vmem>>, vector<1x2xf32>
      %27 = arith.addf %25, %26 : vector<1x2xf32>
      %c0_33 = arith.constant 0 : index
      %c0_34 = arith.constant 0 : index
      %c0_35 = arith.constant 0 : index
      %28 = vector.load %arg6[%c0_33, %c0_34, %c0_35] : memref<1x1x2xf32, #tpu.memory_space<vmem>>, vector<1x1x2xf32>
      %29 = vector.shape_cast %28 : vector<1x1x2xf32> to vector<1x2xf32>
      %30 = vector.shape_cast %27 : vector<1x2xf32> to vector<1x1x2xf32>
      tpu.vector_store %arg6[%c0_33, %c0_34, %c0_35], %30 {strides = array<i32>} : memref<1x1x2xf32, #tpu.memory_space<vmem>>, vector<1x1x2xf32>,
    } else {
    }
    return
  }
  func.func @transform_0(%arg0: i32, %arg1: i32) -> (i32, i32, i32) {
    %c0_i32 = arith.constant 0 : i32
    %c0_i32_0 = arith.constant 0 : i32
    return %arg0, %arg1, %c0_i32 : i32, i32, i32
  }
  func.func @transform_1(%arg0: i32, %arg1: i32) -> (i32, i32, i32) {
    %c0_i32 = arith.constant 0 : i32
    %c0_i32_0 = arith.constant 0 : i32
    return %arg0, %c0_i32, %arg1 : i32, i32, i32
  }
  func.func @transform_2(%arg0: i32, %arg1: i32) -> (i32, i32) {
    %c0_i32 = arith.constant 0 : i32
    %c0_i32_0 = arith.constant 0 : i32
    %c0_i32_1 = arith.constant 0 : i32
    return %c0_i32, %c0_i32_0 : i32, i32
  }
  func.func @transform_3(%arg0: i32, %arg1: i32) -> (i32, i32) {
    %c0_i32 = arith.constant 0 : i32
    %c0_i32_0 = arith.constant 0 : i32
    %c0_i32_1 = arith.constant 0 : i32
    return %c0_i32, %c0_i32_0 : i32, i32
  }
  func.func @transform_4(%arg0: i32, %arg1: i32) -> (i32, i32, i32) {
    %c0_i32 = arith.constant 0 : i32
    %c0_i32_0 = arith.constant 0 : i32
    %c0_i32_1 = arith.constant 0 : i32
    return %arg0, %c0_i32, %c0_i32_0 : i32, i32, i32
  }
}

</mosaic_0001>

<bundles_post_ra>
// kernel: tpu_custom_call.1
= control target key start
LH: loop header
LB: loop body
LE: loop exit
PB: predicated region body
PF: predicated region fallthrough
CT: control target
= control target key end

     0   :  { %9 = vsyncpa [#allocation5], 0  ;;  %s871_s0 = inlined_call_operand.vmem [shape: f32[2,8,32], index: 0, kind: input, shape index: {}]   ;;  %s872_s1 = inlined_call_operand.vmem [shape: f32[2,1,8], index: 1, kind: input, shape index: {}]   ;;  %s873_s2 = inlined_call_operand.vmem [shape: f32[32,2], index: 2, kind: input, shape index: {}]   ;;  %s874_s3 = inlined_call_operand.vmem [shape: f32[1,2], index: 3, kind: input, shape index: {}]   ;;  %s875_s4 = inlined_call_operand.hbm [shape: f32[2,1,2], index: 4, kind: output, shape index: {}]  }
   0x1   :  { %11 = vsyncpa [#allocation5 + $0x1], 0  ;;  %s737_s15 = smov 0   ;;  %s739_s16 = smov 0  }
   0x2   :  { %s741_s17 = smov 0   ;;  %s743_s18 = smov 0  }
   0x3   :  { %s745_s19 = smov 0   ;;  %s747_s20 = smov 0  }
   0x4 LB: > { %s525_s21 = sadd.s32 4294967295, %s705_s20   ;;  %s526_s22 = sadd.s32 4294967294, %s705_s20   ;;  %s705_s20 = sphi %s747_s20, %s17_s20   ;;  %s701_s19 = sphi %s745_s19, %s882_s19   ;;  %s697_s18 = sphi %s743_s18, %s881_s18   ;;  %s693_s17 = sphi %s741_s17, %s880_s17   ;;  %s689_s16 = sphi %s739_s16, %s879_s16   ;;  %s685_s15 = sphi %s737_s15, %s878_s15  }
   0x5   : > { %s29_s23 = sadd.s32 1, %s701_s19  ;;  %s134_s24 = sadd.s32 1, %s693_s17 }
   0x6   : > { %p31_p0 = scmp.ge.s32.totalorder %s29_s23, 2  ;;  %p144_p1 = scmp.ne.s32.totalorder %s693_s17, %s689_s16 }
   0x7   : > { %p145_p2 = scmp.eq.s32.totalorder %s525_s21, 1  ;;  %p150_p3 = scmp.ne.s32.totalorder %s689_s16, %s685_s15 }
   0x8   : > { %s884_s23 = smov (%p31_p0, %s29_s23), 0  ;;  %p151_p5 = scmp.eq.s32.totalorder %s526_s22, 1 }
   0x9   : > { %p777_p4 = por %p145_p2, %p144_p1  ;;  %s131_s26 = ssub.s32 %s701_s19, %s884_s23 }
   0xa   : > { %p529_p6 = scmp.ge.s32.totalorder %s705_s20, 1  ;;  %p132_p7 = scmp.eq.s32.totalorder %s131_s26, 0 }
   0xb   : > { %p784_p8 = por %p151_p5, %p150_p3  ;;  %p194_p9 = scmp.lt.s32.totalorder %s705_s20, 3 }
   0xc   : > { %s790_s28 = scalar_select %p132_p7, %s693_s17, %s134_s24  }
   0xd   : > { %p195_p10 = pnand %p529_p6, %p194_p9 }
   0xe   : > { %p227_p11 = scmp.lt.s32.totalorder (!%p195_p10), %s697_s18, 1  ;;  %v707_v0 = vmov (!%p195_p10), 0.0   ;;  %vm708_vm0 = vmmov (!%p195_p10), 0   ;;  %vm246_vm1 = vcmask (!%p195_p10), 0   ;;  %vm329_vm2 = vcmask (!%p195_p10), 57344   ;;  %v353_v10 = vld [vmem:[%s873_s2] sm:$0xff] (!%p195_p10) }
   0xf   : > { %198 = sbr.rel (%p195_p10) target bundleno = 552 (0x228), region = 36  ;;  %543 = vmatprep.subr.mxu0 (!%p195_p10), %v707_v0  ;;  %545 = vmatprep.mubr.msk.f32.mxu0 (!%p195_p10), %vm708_vm0, %v707_v0  ;;  %247 = vst.msk [vmem:[#allocation3] sm:$0x1] (!%p195_p10), %vm246_vm1, %v707_v0  ;;  %vm251_vm3 = vcmask (!%p195_p10), 64512   ;;  %v709_v4 = vmov (!%p195_p10), 0   ;;  %vm244_vm4 = vcmask (!%p195_p10), 253952   ;;  %v347_v21 = vlaneseq (!%p195_p10) }
  0x10   : > { %556 = vmatprep.mubr.msk.f32.mxu1 (!%p195_p10), %vm708_vm0, %v707_v0  ;;  %624 = vset.pattern.permute.xlu0 (!%p195_p10), %v709_v4  ;;  %245 = vst.msk [vmem:[#allocation2] sm:$0x1] (!%p195_p10), %vm244_vm4, %v707_v0  ;;  %v354_v11 = vld [vmem:[%s873_s2 + $0x8] sm:$0xff] (!%p195_p10)  ;;  %v710_v12 = vmov (!%p195_p10), 0.0|0.0   ;;  %v355_v14 = vld [vmem:[%s873_s2 + $0x10] sm:$0xff] (!%p195_p10)  ;;  %v356_v15 = vld [vmem:[%s873_s2 + $0x18] sm:$0xff] (!%p195_p10) }
  0x11   : > { %559 = vmatprep.subr.bf16.mxu1 (!%p195_p10), %v710_v12  ;;  %v560_v13 = vpack.c.bf16 (!%p195_p10), %v354_v11, %v353_v10  ;;  %v563_v16 = vpack.c.bf16 (!%p195_p10), %v356_v15, %v355_v14  ;;  %v348_v22 = vshrl.u32 (!%p195_p10), %v347_v21, 7  ;;  %vm358_vm5 = vcmask (!%p195_p10), 261120   ;;  %v357_v29 = vld [vmem:[%s874_s3] sm:$0x1] (!%p195_p10) }
  0x12   : > { %vm432_vm6 = vcmask (!%p195_p10), 8192  }
  0x13   : > { %561 = vmatpush3.bf16.msra.mxu1 (!%p195_p10), %v560_v13  ;;  %v349_v23 = vsub.s32 (!%p195_p10), 0, %v348_v22 }
  0x14   : > { %562 = vmatprep.subr.bf16.mxu1 (!%p195_p10), %v710_v12 }
  0x16   : > { %s228_s29 = scalar_select %p227_p11, %s697_s18, 1  ;;  %v328_v5 = vld [vmem:[#allocation3] sm:$0x1] }
  0x17   : > { %564 = vmatpush3.bf16.msra.mxu1 %v563_v16  ;;  %v250_v17 = vld [vmem:[#allocation2] sm:$0x1] }
  0x18   : > { %s239_s6 = scalar_lea.vmem %s872_s1, %s228_s29  ;;  %s530_s7 = sshll.u32 %s228_s29, 3 }
  0x19   : > { %v249_v1 = vld [vmem:[%s239_s6] sm:$0x1]  ;;  %s233_s10 = scalar_lea.vmem %s871_s0, %s530_s7  ;;  %s225_s29 = sand.u32 1, %s689_s16  }
  0x1a   : > { %v330_v2 = vsel %vm329_vm2, %v249_v1, 0.0  ;;  %v248_v3 = vld [vmem:[%s233_s10] sm:$0xff]  ;;  %s533_s6 = sshll.u32 %s697_s18, 4  ;;  %s226_s7 = scalar_lea.vmem [#allocation4], %s225_s29 }
  0x1b   : > { %331 = vadd.xlane.f32.xlu0 %v330_v2  ;;  %544 = vmatpush3.msra.mxu0 %v248_v3  ;;  %s447_s8 = sshll.u32 %s226_s7, 4  ;;  %s824_s11 = scalar_lea.hbm %s875_s4, %s533_s6  ;;  %s826_s8 = int_to_ptr.vmem [resolvable:$true] %s447_s8 }
  0x1c   : > { %546 = vmatmul.mubr.msk.f32.vlgmr.msra.gmra.mrb[0].mxu0 %vm251_vm3, %v249_v1  ;;  %s435_s12 = scalar_lea.sflag [#allocation5], %s225_s29  ;;  %s627_s13 = scalar_lea.vmem %s826_s8, 16 }
  0x1d   : > { %p628_p12 = scmp.ne.s32.totalorder %s826_s8, %s627_s13  ;;  %s711_s18 = smov [#allocation4]  }
  0x1e   : > { %s631_s14 = sshll.u32 %s711_s18, 4  ;;  %s632_s14 = int_to_ptr.vmem [resolvable:$false] %s631_s14 }
  0x1f   : > { %p629_p13 = pnand %p628_p12, %p777_p4  ;;  %s633_s21 = scalar_lea.vmem %s632_s14, 32 }
  0x20   : > { %p634_p1 = scmp.lt.s32.totalorder %s826_s8, %s632_s14  ;;  %p635_p2 = scmp.lt.s32.totalorder %s633_s21, %s627_s13 }
  0x21   : > { %p630_p0 = pneg %p629_p13 }
  0x22   : > { %p636_p3 = por %p635_p2, %p634_p1 }
  0x24   : > { %p637_p5 = pnand %p636_p3, %p630_p0 }
  0xa8   : > { %v332_v6 = vpop.xlane.xlu0 %331 }
  0xa9   : > { %v333_v7 = vadd.f32 %v332_v6, %v328_v5 }
  0xab   : > { %335 = vst.msk [vmem:[#allocation3] sm:$0x1] %vm246_vm1, %v333_v7 }
  0xb2   : > { %v339_v8 = vld [vmem:[#allocation3] sm:$0x1] }
  0xb3   : > { %v340_v9 = vmax.f32 %v339_v8, 1.0 }
  0xb5   : > { %344 = vperm.xlu0 %624, %v340_v9  }
  0xef   : > { %v321_v18 = vpop.f32.mrb[0].mxu0 }
  0xf0   : > { %v325_v19 = vadd.f32 %v321_v18, %v250_v17  ;;  %v547_v20 = vpop.f32.mrb[1].mxu0 }
  0xf2   : > { %327 = vst.msk [vmem:[#allocation2] sm:$0x1] %vm244_vm4, %v325_v19 }
  0xf9   : > { %v341_v26 = vld [vmem:[#allocation2] sm:$0x1] }
 0x134   : > { %v345_v24 = vpop.permute.xlu0 %344 }
 0x135   : > { %v350_v25 = vrot.slane %v345_v24, %v349_v23 }
 0x137   : > { %625 = vrcp.f32 %v350_v25 }
 0x141   : > { %v626_v27 = vpop.eup %625 }
 0x142   : > { %v352_v28 = vmul.f32 %v626_v27, %v341_v26 }
 0x144   : > { %557 = vmatmul.mubr.msk.f32.vlgmr.msra.gmra.mrb[0].mxu1 %vm358_vm5, %v352_v28 }
 0x217   : > { %v428_v30 = vpop.f32.mrb[0].mxu1 }
 0x218   : > { %v429_v31 = vadd.f32 %v428_v30, %v357_v29  ;;  %v558_v32 = vpop.f32.mrb[1].mxu1 }
 0x21a   : > { %433 = vst.msk [vmem:[%s226_s7] sm:$0x1] %vm432_vm6, %v429_v31 }
 0x21b   : > { %640 = shalt.err (!%p637_p5)
}
 0x21c   : > { %s641_s22 = scalar_lea.hbm %s824_s11, 16  ;;  %s645_s29 = scalar_lea.hbm %s875_s4, 32 }
 0x21d   : > { %p642_p6 = scmp.ne.s32.totalorder %s824_s11, %s641_s22  ;;  %p646_p10 = scmp.lt.u32.totalorder %s824_s11, %s875_s4 }
 0x21e   : > { %p647_p11 = scmp.lt.u32.totalorder %s645_s29, %s641_s22  ;;  %p649_p13 = scmp.lt.u32.totalorder %s641_s22, %s824_s11 }
 0x21f   : > { %p643_p7 = pnand %p642_p6, %p777_p4 }
 0x220   : > { %p648_p12 = por %p647_p11, %p646_p10 }
 0x221   : > { %p644_p9 = pneg %p643_p7 }
 0x222   : > { %p650_p0 = por %p649_p13, %p648_p12 }
 0x224   : > { %p651_p1 = pnand %p650_p0, %p644_p9 }
 0x226   : > { %654 = shalt.err (!%p651_p1)
}
 0x227   : > { %565 = dma.vmem_to_hbm [thread:$0]  (%p777_p4), %s826_s8, 16, %s824_s11, %s435_s12  }
 0x228 PF: > { %p571_p2 = scmp.ge.s32.totalorder %s705_s20, 2  ;;  %s459_s6 = sand.u32 1, %s685_s15  }
 0x229   : > { %s460_s7 = scalar_lea.sflag [#allocation5], %s459_s6 }
 0x22a   : > { %p568_p3 = pnand %p571_p2, %p784_p8 }
 0x22c   : > { %680 = dma.done.wait (!%p568_p3), %s460_s7, 16  }
 0x22d   : > { %682 = vsyncadd (!%p568_p3), %s460_s7, 4294967280  ;;  %s17_s20 = sadd.s32 1, %s705_s20   ;;  %s878_s15 = smov %s689_s16 }
 0x22e   : > { %p14_p5 = scmp.ge.s32.totalorder %s17_s20, 4   ;;  %s879_s16 = smov %s693_s17 }
 0x22f   : > { %s880_s17 = smov %s790_s28  ;;  %s881_s18 = smov %s701_s19 }
 0x230   : > { %s882_s19 = smov %s884_s23  ;;  %16 = sbr.rel (!%p14_p5) target bundleno = 4 (0x4), region = 82 }
 0x237   :  { %464 = vsyncpa [#allocation5], 1 }
 0x238   :  { %466 = vsyncpa [#allocation5 + $0x1], 1 }

</bundles_post_ra>
